<compile_context>
chip_gen: v7x
topology: tpu7x:2x2x1
jax: 0.10.0
libtpu: 0.0.40
codegen_flags: <defaults>
</compile_context>

<pallas_src>
import functools

import numpy as np

import jax
import jax.numpy as jnp
from jax.experimental import pallas as pl
from jax.experimental.pallas import tpu as pltpu


def _round_up(n, m):
    return ((n + m - 1) // m) * m


# ----------------------------- fused Pallas kernel ---------------------------

def _fused_kernel(alpha_ref, pt_ref, wbd_ref, w1_ref, b1_ref, w2_ref, b2_ref,
                  out_ref, *, num_filters, batch_pad, pool_pad):
    F, Bp, Pp = num_filters, batch_pad, pool_pad

    # Conv for all four 2x2-pool offsets in ONE MXU matmul.
    #   wbd: (F*Bp, BKp) block-diagonal conv weight, pt: (BKp, 4*Pp) patches.
    conv_all = jnp.dot(wbd_ref[...], pt_ref[...],
                       preferred_element_type=jnp.float32)        # (F*Bp, 4*Pp)

    # Fused 2x2 max-pool: elementwise max of the 128-lane-aligned chunks (VPU).
    pooled = jnp.maximum(
        jnp.maximum(conv_all[:, 0:Pp], conv_all[:, Pp:2 * Pp]),
        jnp.maximum(conv_all[:, 2 * Pp:3 * Pp], conv_all[:, 3 * Pp:4 * Pp]))

    # NCHW flatten as a lane-aligned concat, keeping the full Bp sublanes:
    #   a[b, f*Pp + p] = pooled[f*Bp + b, p].  Padded batch rows are zero (zero wbd
    # rows); padded lanes are zero (zero pt columns) and zero w1 rows kill them.
    a = jnp.concatenate([pooled[f * Bp:(f + 1) * Bp, :] for f in range(F)],
                        axis=1)                                    # (Bp, F*Pp)

    # Linear1 (conv bias pre-folded into b1) -> PReLU -> Linear2, all full-vreg.
    h = jnp.dot(a, w1_ref[...], preferred_element_type=jnp.float32) + b1_ref[...]
    alpha = alpha_ref[0, 0]
    h = jnp.where(h > 0, h, alpha * h)
    out_ref[...] = (jnp.dot(h, w2_ref[...], preferred_element_type=jnp.float32)
                    + b2_ref[...])                                 # (Bp, Op)


# ------------------------------- param prep (one-time) ------------------------

def _build_patch_index(B, C, H, W, k, Ph, Pw, Pp):
    """int32 (BKp, 4*Pp) gather table into x.flatten(); padding points at the
    appended zero element (index B*C*H*W).

    Row   = b*K + (c*k + ki)*k + kj   (PyTorch conv-weight flatten order)
    Col   = w*Pp + (ph*Pw + pw), w = di*2 + dj
    Value = flat index of x[b, c, 2*ph + di + ki, 2*pw + dj + kj]
    """
    K = C * k * k
    BK = B * K
    BKp = _round_up(BK, 8)
    P = Ph * Pw
    pad_idx = B * C * H * W

    b = np.arange(B)[:, None, None, None, None, None, None, None]
    c = np.arange(C)[None, :, None, None, None, None, None, None]
    ki = np.arange(k)[None, None, :, None, None, None, None, None]
    kj = np.arange(k)[None, None, None, :, None, None, None, None]
    di = np.arange(2)[None, None, None, None, :, None, None, None]
    dj = np.arange(2)[None, None, None, None, None, :, None, None]
    ph = np.arange(Ph)[None, None, None, None, None, None, :, None]
    pw = np.arange(Pw)[None, None, None, None, None, None, None, :]

    flat = ((b * C + c) * H + (2 * ph + di + ki)) * W + (2 * pw + dj + kj)
    flat = np.broadcast_to(flat, (B, C, k, k, 2, 2, Ph, Pw)).reshape(BK, 4, P)

    idx = np.full((BKp, 4, Pp), pad_idx, dtype=np.int32)
    idx[:BK, :, :P] = flat
    return jnp.asarray(idx.reshape(BKp, 4 * Pp))


def prepare_params(wc_t, bc, w1_t, b1, alpha, w2_t, b2, *, batch, input_size,
                   kernel_size):
    """One-time re-layout of the PyTorch weights into kernel-friendly matrices."""
    H, W = input_size
    F, C, k, _ = wc_t.shape
    assert k == kernel_size
    K = C * k * k
    Ho, Wo = H - k + 1, W - k + 1
    Ph, Pw = Ho // 2, Wo // 2
    P = Ph * Pw
    Pp = _round_up(P, 128)              # lane-dense pool positions
    Bp = _round_up(batch, 8)            # sublane-aligned per-filter row blocks
    BK = batch * K
    BKp = _round_up(BK, 8)              # sublane-aligned contraction dim
    hidden = w1_t.shape[0]
    Hp = _round_up(hidden, 128)         # lane-dense hidden dim
    O = w2_t.shape[0]
    Op = _round_up(O, 128)              # lane-dense output dim

    # Block-diagonal conv weight: wbd[f*Bp + r, b*K + kk] = delta(r,b) * Wc[f, kk],
    # padded to BKp zero columns to match the padded patch rows.
    wc_flat = wc_t.reshape(F, K).astype(jnp.float32)
    eye_pad = jnp.eye(Bp, batch, dtype=jnp.float32)
    wbd = jnp.einsum("rb,fk->frbk", eye_pad, wc_flat).reshape(F * Bp, BK)
    wbd = jnp.pad(wbd, ((0, 0), (0, BKp - BK)))

    # Linear1 weight pre-permuted to the in-kernel (f-major, Pp-padded) layout,
    # hidden padded to Hp lanes (zero rows/cols kill all padding exactly).
    w1r = w1_t.astype(jnp.float32).reshape(hidden, F, P)
    w1r = jnp.transpose(w1r, (1, 2, 0))                            # (F, P, hidden)
    w1r = jnp.pad(w1r, ((0, 0), (0, Pp - P), (0, 0)))
    w1cat = jnp.pad(w1r.reshape(F * Pp, hidden), ((0, 0), (0, Hp - hidden)))

    # Fold the conv bias into the Linear1 bias:
    #   b1_eff[n] = b1[n] + sum_{f,p} w1[n, f*P+p] * bc[f]   (exact).
    b1_eff = b1.astype(jnp.float32) + jnp.einsum(
        "hfp,f->h", w1_t.astype(jnp.float32).reshape(hidden, F, P),
        bc.astype(jnp.float32))
    b1_eff = jnp.pad(b1_eff.reshape(1, hidden), ((0, 0), (0, Hp - hidden)))

    w2p = jnp.pad(w2_t.astype(jnp.float32).T, ((0, Hp - hidden), (0, Op - O)))
    b2p = jnp.pad(b2.astype(jnp.float32).reshape(1, O), ((0, 0), (0, Op - O)))

    return {
        "alpha": jnp.full((1, 1), alpha, jnp.float32),
        "idx": _build_patch_index(batch, C, H, W, k, Ph, Pw, Pp),
        "wbd": wbd,
        "w1": w1cat,
        "b1": b1_eff,
        "w2": w2p,
        "b2": b2p,
    }


# ------------------------------- forward ---------------------------------------

@functools.partial(jax.jit, static_argnames=("out_features",))
def network_forward(x, params, *, out_features):
    """x: (B, 3, H, W) float32 NCHW. Returns (B, out_features)."""
    B = x.shape[0]
    Bp = _round_up(B, 8)
    F = params["wbd"].shape[0] // Bp
    Pp = params["w1"].shape[0] // F
    Op = params["w2"].shape[1]

    # im2col patch matrix as a single gather (one XLA op in the hot path).
    x_flat = jnp.concatenate([x.reshape(-1), jnp.zeros((1,), x.dtype)])
    pt = jnp.take(x_flat, params["idx"], axis=0)                   # (BKp, 4*Pp) f32

    kernel = functools.partial(_fused_kernel, num_filters=F, batch_pad=Bp,
                               pool_pad=Pp)
    vmem = pl.BlockSpec(memory_space=pltpu.MemorySpace.VMEM)
    smem = pl.BlockSpec(memory_space=pltpu.MemorySpace.SMEM)
    # TODO(synk): if batch ever grows, tile over batch row-blocks with a grid +
    # dimension_semantics=("parallel",) (v7x: 2 TCs), build wbd per-tile
    # (F*Btile, Btile*K), and size tiles against v7x's 64 MiB VMEM.
    out_pad = pl.pallas_call(
        kernel,
        out_shape=jax.ShapeDtypeStruct((Bp, Op), jnp.float32),     # lane/sublane-dense
        in_specs=[smem, vmem, vmem, vmem, vmem, vmem, vmem],
        out_specs=vmem,
    )(params["alpha"], pt, params["wbd"], params["w1"], params["b1"],
      params["w2"], params["b2"])
    return out_pad[:B, :out_features]                              # free XLA slice


# --------------------------- reference (pure JAX) -----------------------------

def reference(x, wc_t, bc, w1_t, b1, alpha, w2_t, b2):
    conv = jax.lax.conv_general_dilated(
        x, wc_t, (1, 1), "VALID", dimension_numbers=("NCHW", "OIHW", "NCHW")
    ) + bc.reshape(1, -1, 1, 1)
    pooled = jax.lax.reduce_window(
        conv, -jnp.inf, jax.lax.max, (1, 1, 2, 2), (1, 1, 2, 2), "VALID")
    flat = pooled.reshape(x.shape[0], -1)
    h = flat @ w1_t.T + b1
    h = jnp.where(h > 0, h, alpha * h)
    return h @ w2_t.T + b2


# ----------------------------------- main --------------------------------------

if __name__ == "__main__":
    key = jax.random.PRNGKey(0)
    ks = jax.random.split(key, 7)

    B, C, H, W = 2, 3, 16, 16        # input_size = (16, 16), Conv2d has 3 in-channels
    ksz, F, OUT = 3, 4, 6            # kernel_size=3, num_filters=4, out_features=6
    HIDDEN = 32
    in1 = F * ((H - ksz + 1) // 2) * ((W - ksz + 1) // 2)   # 4 * 7 * 7 = 196

    x = jax.random.normal(ks[0], (B, C, H, W), jnp.float32)
    wc_t = jax.random.normal(ks[1], (F, C, ksz, ksz), jnp.float32) * 0.1
    bc = jax.random.normal(ks[2], (F,), jnp.float32) * 0.1
    w1_t = jax.random.normal(ks[3], (HIDDEN, in1), jnp.float32) * 0.05
    b1 = jax.random.normal(ks[4], (HIDDEN,), jnp.float32) * 0.05
    w2_t = jax.random.normal(ks[5], (OUT, HIDDEN), jnp.float32) * 0.1
    b2 = jax.random.normal(ks[6], (OUT,), jnp.float32) * 0.1
    alpha = jnp.float32(0.25)        # PReLU default init

    params = prepare_params(wc_t, bc, w1_t, b1, alpha, w2_t, b2,
                            batch=B, input_size=(H, W), kernel_size=ksz)

    out = network_forward(x, params, out_features=OUT)
    out = jax.block_until_ready(out)

    ref = reference(x, wc_t, bc, w1_t, b1, alpha, w2_t, b2)
    assert out.shape == (B, OUT)
    assert jnp.allclose(out, ref, atol=1e-4, rtol=1e-4), (out, ref)

    print("KERNEL_OK")
</pallas_src>

<mosaic_0001>
module attributes {stable_mosaic.version = 11 : i64} {
  func.func @_fused_kernel(%arg0: memref<1x1xf32, #tpu.memory_space<smem>>, %arg1: memref<56x512xf32, #tpu.memory_space<vmem>>, %arg2: memref<32x56xf32, #tpu.memory_space<vmem>>, %arg3: memref<512x128xf32, #tpu.memory_space<vmem>>, %arg4: memref<1x128xf32, #tpu.memory_space<vmem>>, %arg5: memref<128x128xf32, #tpu.memory_space<vmem>>, %arg6: memref<1x128xf32, #tpu.memory_space<vmem>>, %arg7: memref<8x128xf32, #tpu.memory_space<vmem>>) attributes {dimension_semantics = [], scalar_prefetch = 0 : i64, scratch_operands = 0 : i64, tpu.core_type = #tpu.core_type<tc>} {
    %c0 = arith.constant 0 : index
    %c0_0 = arith.constant 0 : index
    %0 = vector.load %arg2[%c0, %c0_0] : memref<32x56xf32, #tpu.memory_space<vmem>>, vector<32x56xf32>
    %c0_1 = arith.constant 0 : index
    %c0_2 = arith.constant 0 : index
    %1 = vector.load %arg1[%c0_1, %c0_2] : memref<56x512xf32, #tpu.memory_space<vmem>>, vector<56x512xf32>
    %cst = arith.constant dense<0.000000e+00> : vector<32x512xf32>
    %2 = tpu.matmul %0, %1, %cst {dimension_numbers = #tpu.dot_dimension_numbers<[1], [0], [0], [1], [0, 0, 1, 1], [], []>} : vector<32x56xf32>, vector<56x512xf32>, vector<32x512xf32> -> vector<32x512xf32>
    %3 = vector.extract_strided_slice %2 {offsets = [0, 0], sizes = [32, 128], strides = [1, 1]} : vector<32x512xf32> to vector<32x128xf32>
    %4 = vector.extract_strided_slice %2 {offsets = [0, 128], sizes = [32, 128], strides = [1, 1]} : vector<32x512xf32> to vector<32x128xf32>
    %5 = arith.maximumf %3, %4 : vector<32x128xf32>
    %6 = vector.extract_strided_slice %2 {offsets = [0, 256], sizes = [32, 128], strides = [1, 1]} : vector<32x512xf32> to vector<32x128xf32>
    %7 = vector.extract_strided_slice %2 {offsets = [0, 384], sizes = [32, 128], strides = [1, 1]} : vector<32x512xf32> to vector<32x128xf32>
    %8 = arith.maximumf %6, %7 : vector<32x128xf32>
    %9 = arith.maximumf %5, %8 : vector<32x128xf32>
    %10 = vector.extract_strided_slice %9 {offsets = [0, 0], sizes = [8, 128], strides = [1, 1]} : vector<32x128xf32> to vector<8x128xf32>
    %11 = vector.extract_strided_slice %9 {offsets = [8, 0], sizes = [8, 128], strides = [1, 1]} : vector<32x128xf32> to vector<8x128xf32>
    %12 = vector.extract_strided_slice %9 {offsets = [16, 0], sizes = [8, 128], strides = [1, 1]} : vector<32x128xf32> to vector<8x128xf32>
    %13 = vector.extract_strided_slice %9 {offsets = [24, 0], sizes = [8, 128], strides = [1, 1]} : vector<32x128xf32> to vector<8x128xf32>
    %14 = tpu.concatenate %10, %11, %12, %13 in 1 : vector<8x128xf32>, vector<8x128xf32>, vector<8x128xf32>, vector<8x128xf32> -> vector<8x512xf32>
    %c0_3 = arith.constant 0 : index
    %c0_4 = arith.constant 0 : index
    %15 = vector.load %arg3[%c0_3, %c0_4] : memref<512x128xf32, #tpu.memory_space<vmem>>, vector<512x128xf32>
    %cst_5 = arith.constant dense<0.000000e+00> : vector<8x128xf32>
    %16 = tpu.matmul %14, %15, %cst_5 {dimension_numbers = #tpu.dot_dimension_numbers<[1], [0], [0], [1], [0, 0, 1, 1], [], []>} : vector<8x512xf32>, vector<512x128xf32>, vector<8x128xf32> -> vector<8x128xf32>
    %c0_6 = arith.constant 0 : index
    %c0_7 = arith.constant 0 : index
    %17 = vector.load %arg4[%c0_6, %c0_7] : memref<1x128xf32, #tpu.memory_space<vmem>>, vector<1x128xf32>
    %18 = vector.broadcast %17 : vector<1x128xf32> to vector<8x128xf32>
    %19 = arith.addf %16, %18 : vector<8x128xf32>
    %c0_8 = arith.constant 0 : index
    %c0_9 = arith.constant 0 : index
    %20 = memref.load %arg0[%c0_8, %c0_9] : memref<1x1xf32, #tpu.memory_space<smem>>
    %cst_10 = arith.constant 0.000000e+00 : f32
    %21 = vector.broadcast %cst_10 : f32 to vector<8x128xf32>
    %22 = arith.cmpf ogt, %19, %21 : vector<8x128xf32>
    %23 = vector.broadcast %20 : f32 to vector<8x128xf32>
    %24 = arith.mulf %23, %19 : vector<8x128xf32>
    %25 = arith.select %22, %19, %24 : vector<8x128xi1>, vector<8x128xf32>
    %c0_11 = arith.constant 0 : index
    %c0_12 = arith.constant 0 : index
    %26 = vector.load %arg5[%c0_11, %c0_12] : memref<128x128xf32, #tpu.memory_space<vmem>>, vector<128x128xf32>
    %cst_13 = arith.constant dense<0.000000e+00> : vector<8x128xf32>
    %27 = tpu.matmul %25, %26, %cst_13 {dimension_numbers = #tpu.dot_dimension_numbers<[1], [0], [0], [1], [0, 0, 1, 1], [], []>} : vector<8x128xf32>, vector<128x128xf32>, vector<8x128xf32> -> vector<8x128xf32>
    %c0_14 = arith.constant 0 : index
    %c0_15 = arith.constant 0 : index
    %28 = vector.load %arg6[%c0_14, %c0_15] : memref<1x128xf32, #tpu.memory_space<vmem>>, vector<1x128xf32>
    %29 = vector.broadcast %28 : vector<1x128xf32> to vector<8x128xf32>
    %30 = arith.addf %27, %29 : vector<8x128xf32>
    %c0_16 = arith.constant 0 : index
    %c0_17 = arith.constant 0 : index
    %31 = vector.load %arg7[%c0_16, %c0_17] : memref<8x128xf32, #tpu.memory_space<vmem>>, vector<8x128xf32>
    tpu.vector_store %arg7[%c0_16, %c0_17], %30 {strides = array<i32>} : memref<8x128xf32, #tpu.memory_space<vmem>>, vector<8x128xf32>,
    return
  }
}

</mosaic_0001>

<bundles_post_ra>
// kernel: network_forward.1
= control target key start
LH: loop header
LB: loop body
LE: loop exit
PB: predicated region body
PF: predicated region fallthrough
CT: control target
= control target key end

     0   :  { %v823_v3 = vmov 0.0   ;;  %vm59_vm0 = vcmask 457728   ;;  %vm825_vm1 = vmmov 0   ;;  %s1239_s1 = inlined_call_operand.vmem [shape: f32[56,512], index: 1, kind: input, shape index: {}]   ;;  %s1240_s3 = inlined_call_operand.vmem [shape: f32[512,128], index: 3, kind: input, shape index: {}]   ;;  %s1241_s2 = inlined_call_operand.vmem [shape: f32[32,56], index: 2, kind: input, shape index: {}]   ;;  %s1242_s5 = inlined_call_operand.vmem [shape: f32[128,128], index: 5, kind: input, shape index: {}]   ;;  %s1243_s4 = inlined_call_operand.vmem [shape: f32[1,128], index: 4, kind: input, shape index: {}]   ;;  %s1244_s0 = inlined_call_operand.<no memory space> [shape: f32[1,1], index: 0, kind: input, shape index: {}]   ;;  %s1245_s6 = inlined_call_operand.vmem [shape: f32[1,128], index: 6, kind: input, shape index: {}]   ;;  %s1246_s7 = inlined_call_operand.vmem [shape: f32[8,128], index: 7, kind: output, shape index: {}]  }
   0x1   :  { %v32_v0 = vld [vmem:[%s1239_s1 + $0x8] sm:$0xff]  ;;  %v31_v2 = vld [vmem:[%s1239_s1] sm:$0xff]  ;;  %136 = vmatprep.mubr.f32.mxu1 %v823_v3  ;;  %v34_v20 = vld [vmem:[%s1239_s1 + $0x18] sm:$0xff] }
   0x2   :  { %v36_v1 = vld [vmem:[%s1239_s1 + $0x28] sm:$0xff]  ;;  %v35_v5 = vld [vmem:[%s1239_s1 + $0x20] sm:$0xff]  ;;  %v38_v21 = vld [vmem:[%s1239_s1 + $0x38] sm:$0xff] }
   0x3   :  { %v708_v4 = vpack.c.bf16 %v36_v1, %v32_v0  ;;  %v40_v6 = vld [vmem:[%s1239_s1 + $0x48] sm:$0xff]  ;;  %v710_v8 = vpack.c.bf16 %v35_v5, %v31_v2  ;;  %v39_v10 = vld [vmem:[%s1239_s1 + $0x40] sm:$0xff]  ;;  %v33_v22 = vld [vmem:[%s1239_s1 + $0x10] sm:$0xff]  ;;  %v720_v35 = vpack.c.bf16 %v38_v21, %v34_v20 }
   0x4   :  { %v44_v7 = vld [vmem:[%s1239_s1 + $0x68] sm:$0xff]  ;;  %v43_v11 = vld [vmem:[%s1239_s1 + $0x60] sm:$0xff]  ;;  %v37_v23 = vld [vmem:[%s1239_s1 + $0x30] sm:$0xff] }
   0x5   :  { %v712_v9 = vpack.c.bf16 %v44_v7, %v40_v6  ;;  %v48_v12 = vld [vmem:[%s1239_s1 + $0x88] sm:$0xff]  ;;  %709 = vmatprep.subr.bf16.mxu1 %v708_v4  ;;  %v714_v14 = vpack.c.bf16 %v43_v11, %v39_v10  ;;  %v47_v16 = vld [vmem:[%s1239_s1 + $0x80] sm:$0xff]  ;;  %v42_v24 = vld [vmem:[%s1239_s1 + $0x58] sm:$0xff]  ;;  %v722_v38 = vpack.c.bf16 %v37_v23, %v33_v22 }
   0x6   :  { %v52_v13 = vld [vmem:[%s1239_s1 + $0xa8] sm:$0xff]  ;;  %711 = vmatpush1.bf16.msra.mxu1 %v710_v8  ;;  %v51_v17 = vld [vmem:[%s1239_s1 + $0xa0] sm:$0xff]  ;;  %v46_v29 = vld [vmem:[%s1239_s1 + $0x78] sm:$0xff] }
   0x7   :  { %713 = vmatprep.subr.bf16.mxu1 %v712_v9  ;;  %v716_v15 = vpack.c.bf16 %v52_v13, %v48_v12  ;;  %v718_v18 = vpack.c.bf16 %v51_v17, %v47_v16  ;;  %v56_v19 = vld [vmem:[%s1239_s1 + $0xc8] sm:$0xff]  ;;  %v278_v25 = vld [vmem:[%s1240_s3 + $0x80] sm:$0xff]  ;;  %v280_v32 = vld [vmem:[%s1240_s3 + $0x90] sm:$0xff]  ;;  %v724_v39 = vpack.c.bf16 %v46_v29, %v42_v24 }
   0x8   :  { %v279_v26 = vld [vmem:[%s1240_s3 + $0x88] sm:$0xff]  ;;  %v262_v27 = vld [vmem:[%s1240_s3] sm:$0xff]  ;;  %v281_v33 = vld [vmem:[%s1240_s3 + $0x98] sm:$0xff] }
   0x9   :  { %v263_v28 = vld [vmem:[%s1240_s3 + $0x8] sm:$0xff]  ;;  %v732_v30 = vpack.c.bf16 %v279_v26, %v278_v25  ;;  %v55_v34 = vld [vmem:[%s1239_s1 + $0xc0] sm:$0xff]  ;;  %v736_v36 = vpack.c.bf16 %v281_v33, %v280_v32  ;;  %v41_v40 = vld [vmem:[%s1239_s1 + $0x50] sm:$0xff] }
   0xa   :  { %715 = vmatpush1.bf16.msra.mxu1 %v714_v14  ;;  %v734_v31 = vpack.c.bf16 %v263_v28, %v262_v27  ;;  %v27_v37 = vld [vmem:[%s1241_s2] sm:$0xff]  ;;  %v45_v41 = vld [vmem:[%s1239_s1 + $0x70] sm:$0xff]  ;;  %v50_v42 = vld [vmem:[%s1239_s1 + $0x98] sm:$0xff] }
   0xb   :  { %717 = vmatprep.subr.bf16.mxu1 %v716_v15  ;;  %733 = vmatprep.subr.bf16.mxu0 %v732_v30  ;;  %v54_v43 = vld [vmem:[%s1239_s1 + $0xb8] sm:$0xff]  ;;  %v28_v44 = vld [vmem:[%s1241_s2 + $0x8] sm:$0xff]  ;;  %v726_v45 = vpack.c.bf16 %v45_v41, %v41_v40  ;;  %v49_v47 = vld [vmem:[%s1239_s1 + $0x90] sm:$0xff] }
   0xc   :  { %735 = vmatpush3.bf16.msra.mxu0 %v734_v31  ;;  %v728_v46 = vpack.c.bf16 %v54_v43, %v50_v42  ;;  %v53_v48 = vld [vmem:[%s1239_s1 + $0xb0] sm:$0xff]  ;;  %v58_v51 = vld [vmem:[%s1239_s1 + $0xd8] sm:$0xff]  ;;  %v282_v57 = vld [vmem:[%s1240_s3 + $0xa0] sm:$0xff] }
   0xd   :  { %737 = vmatprep.subr.bf16.mxu0 %v736_v36  ;;  %v29_v49 = vld [vmem:[%s1241_s2 + $0x10] sm:$0xff]  ;;  %v730_v50 = vpack.c.bf16 %v53_v48, %v49_v47  ;;  %v30_v52 = vld [vmem:[%s1241_s2 + $0x18] sm:$0xff]  ;;  %v283_v58 = vld [vmem:[%s1240_s3 + $0xa8] sm:$0xff] }
   0xe   :  { %719 = vmatpush1.bf16.msra.mxu1 %v718_v18  ;;  %v57_v53 = vld [vmem:[%s1239_s1 + $0xd0] sm:$0xff]  ;;  %v265_v55 = vld [vmem:[%s1240_s3 + $0x18] sm:$0xff]  ;;  %v310_v59 = vld [vmem:[%s1240_s3 + $0x180] sm:$0xff]  ;;  %v740_v60 = vpack.c.bf16 %v283_v58, %v282_v57 }
   0xf   :  { %84 = vmatprep.subr.mxu1 %v56_v19  ;;  %v264_v54 = vld [vmem:[%s1240_s3 + $0x10] sm:$0xff]  ;;  %v311_v61 = vld [vmem:[%s1240_s3 + $0x188] sm:$0xff]  ;;  %v266_v62 = vld [vmem:[%s1240_s3 + $0x20] sm:$0xff] }
  0x10   :  { %v738_v56 = vpack.c.bf16 %v265_v55, %v264_v54  ;;  %v267_v63 = vld [vmem:[%s1240_s3 + $0x28] sm:$0xff]  ;;  %v764_v0 = vpack.c.bf16 %v311_v61, %v310_v59  ;;  %v294_v2 = vld [vmem:[%s1240_s3 + $0x100] sm:$0xff]  ;;  %v284_v6 = vld [vmem:[%s1240_s3 + $0xb0] sm:$0xff] }
  0x11   :  { %v742_v1 = vpack.c.bf16 %v267_v63, %v266_v62  ;;  %v295_v4 = vld [vmem:[%s1240_s3 + $0x108] sm:$0xff]  ;;  %v285_v7 = vld [vmem:[%s1240_s3 + $0xb8] sm:$0xff]  ;;  %v312_v8 = vld [vmem:[%s1240_s3 + $0x190] sm:$0xff] }
  0x12   :  { %85 = vmatpush1.msra.mxu1 %v55_v34  ;;  %739 = vmatpush3.bf16.msra.mxu0 %v738_v56  ;;  %v766_v5 = vpack.c.bf16 %v295_v4, %v294_v2  ;;  %v744_v9 = vpack.c.bf16 %v285_v7, %v284_v6  ;;  %v313_v10 = vld [vmem:[%s1240_s3 + $0x198] sm:$0xff]  ;;  %v268_v11 = vld [vmem:[%s1240_s3 + $0x30] sm:$0xff]  ;;  %v286_v18 = vld [vmem:[%s1240_s3 + $0xc0] sm:$0xff] }
  0x13   :  { %576 = vmatmul.mubr.msk.f32.vlgmr.msra.gmra.mrb[0].mxu1 %vm59_vm0, %v27_v37  ;;  %721 = vmatprep.subr.bf16.mxu1 %v720_v35  ;;  %v269_v12 = vld [vmem:[%s1240_s3 + $0x38] sm:$0xff]  ;;  %v768_v13 = vpack.c.bf16 %v313_v10, %v312_v8  ;;  %v296_v15 = vld [vmem:[%s1240_s3 + $0x110] sm:$0xff]  ;;  %v287_v19 = vld [vmem:[%s1240_s3 + $0xc8] sm:$0xff] }
  0x14   :  { %723 = vmatpush1.bf16.msra.mxu1 %v722_v38  ;;  %142 = vmatprep.mubr.f32.mxu1 %v823_v3  ;;  %v746_v14 = vpack.c.bf16 %v269_v12, %v268_v11  ;;  %v297_v16 = vld [vmem:[%s1240_s3 + $0x118] sm:$0xff]  ;;  %v314_v20 = vld [vmem:[%s1240_s3 + $0x1a0] sm:$0xff]  ;;  %v748_v21 = vpack.c.bf16 %v287_v19, %v286_v18  ;;  %v315_v22 = vld [vmem:[%s1240_s3 + $0x1a8] sm:$0xff] }
  0x15   :  { %725 = vmatprep.subr.bf16.mxu1 %v724_v39  ;;  %741 = vmatprep.subr.bf16.mxu0 %v740_v60  ;;  %v770_v17 = vpack.c.bf16 %v297_v16, %v296_v15  ;;  %v270_v23 = vld [vmem:[%s1240_s3 + $0x40] sm:$0xff]  ;;  %v271_v24 = vld [vmem:[%s1240_s3 + $0x48] sm:$0xff]  ;;  %v772_v25 = vpack.c.bf16 %v315_v22, %v314_v20  ;;  %v288_v30 = vld [vmem:[%s1240_s3 + $0xd0] sm:$0xff]  ;;  %v824_v15 = vmov 0.0|0.0  }
  0x16   :  { %743 = vmatpush3.bf16.msra.mxu0 %v742_v1  ;;  %v750_v26 = vpack.c.bf16 %v271_v24, %v270_v23  ;;  %v298_v27 = vld [vmem:[%s1240_s3 + $0x120] sm:$0xff]  ;;  %v299_v28 = vld [vmem:[%s1240_s3 + $0x128] sm:$0xff]  ;;  %v289_v31 = vld [vmem:[%s1240_s3 + $0xd8] sm:$0xff] }
  0x17   :  { %577 = vmatmul.mubr.msk.f32.gmra.mrb[2].mxu1 %vm59_vm0, %v28_v44  ;;  %745 = vmatprep.subr.bf16.mxu0 %v744_v9  ;;  %v774_v29 = vpack.c.bf16 %v299_v28, %v298_v27  ;;  %v316_v32 = vld [vmem:[%s1240_s3 + $0x1b0] sm:$0xff]  ;;  %v752_v33 = vpack.c.bf16 %v289_v31, %v288_v30  ;;  %v317_v34 = vld [vmem:[%s1240_s3 + $0x1b8] sm:$0xff]  ;;  %v290_v42 = vld [vmem:[%s1240_s3 + $0xe0] sm:$0xff] }
  0x18   :  { %727 = vmatpush1.bf16.msra.mxu1 %v726_v45  ;;  %148 = vmatprep.mubr.f32.mxu1 %v823_v3  ;;  %v272_v35 = vld [vmem:[%s1240_s3 + $0x50] sm:$0xff]  ;;  %v273_v36 = vld [vmem:[%s1240_s3 + $0x58] sm:$0xff]  ;;  %v291_v43 = vld [vmem:[%s1240_s3 + $0xe8] sm:$0xff] }
  0x19   :  { %729 = vmatprep.subr.bf16.mxu1 %v728_v46  ;;  %v754_v38 = vpack.c.bf16 %v273_v36, %v272_v35  ;;  %v300_v39 = vld [vmem:[%s1240_s3 + $0x130] sm:$0xff]  ;;  %v301_v40 = vld [vmem:[%s1240_s3 + $0x138] sm:$0xff]  ;;  %v756_v45 = vpack.c.bf16 %v291_v43, %v290_v42  ;;  %v319_v46 = vld [vmem:[%s1240_s3 + $0x1c8] sm:$0xff] }
  0x1a   :  { %747 = vmatpush3.bf16.msra.mxu0 %v746_v14  ;;  %v778_v41 = vpack.c.bf16 %v301_v40, %v300_v39  ;;  %v274_v47 = vld [vmem:[%s1240_s3 + $0x60] sm:$0xff]  ;;  %v275_v48 = vld [vmem:[%s1240_s3 + $0x68] sm:$0xff]  ;;  %v292_v54 = vld [vmem:[%s1240_s3 + $0xf0] sm:$0xff] }
  0x1b   :  { %578 = vmatmul.mubr.msk.f32.gmra.mrb[4].mxu1 %vm59_vm0, %v29_v49  ;;  %749 = vmatprep.subr.bf16.mxu0 %v748_v21  ;;  %v293_v55 = vld [vmem:[%s1240_s3 + $0xf8] sm:$0xff]  ;;  %v320_v56 = vld [vmem:[%s1240_s3 + $0x1d0] sm:$0xff]  ;;  %v322_v2 = vld [vmem:[%s1240_s3 + $0x1e0] sm:$0xff] }
  0x1c   :  { %731 = vmatpush1.bf16.msra.mxu1 %v730_v50  ;;  %154 = vmatprep.mubr.f32.mxu1 %v823_v3  ;;  %v758_v50 = vpack.c.bf16 %v275_v48, %v274_v47  ;;  %v760_v57 = vpack.c.bf16 %v293_v55, %v292_v54  ;;  %v321_v58 = vld [vmem:[%s1240_s3 + $0x1d8] sm:$0xff]  ;;  %v276_v59 = vld [vmem:[%s1240_s3 + $0x70] sm:$0xff]  ;;  %v323_v4 = vld [vmem:[%s1240_s3 + $0x1e8] sm:$0xff] }
  0x1d   :  { %173 = vmatprep.subr.mxu1 %v58_v51  ;;  %v302_v51 = vld [vmem:[%s1240_s3 + $0x140] sm:$0xff]  ;;  %v277_v60 = vld [vmem:[%s1240_s3 + $0x78] sm:$0xff]  ;;  %v784_v61 = vpack.c.bf16 %v321_v58, %v320_v56  ;;  %v304_v63 = vld [vmem:[%s1240_s3 + $0x150] sm:$0xff] }
  0x1e   :  { %751 = vmatpush3.bf16.msra.mxu0 %v750_v26  ;;  %v762_v62 = vpack.c.bf16 %v277_v60, %v276_v59  ;;  %v306_v6 = vld [vmem:[%s1240_s3 + $0x160] sm:$0xff]  ;;  %v307_v7 = vld [vmem:[%s1240_s3 + $0x168] sm:$0xff]  ;;  %v324_v9 = vld [vmem:[%s1240_s3 + $0x1f0] sm:$0xff] }
  0x1f   :  { %579 = vmatmul.mubr.msk.f32.gmra.mrb[6].mxu1 %vm59_vm0, %v30_v52  ;;  %753 = vmatprep.subr.bf16.mxu0 %v752_v33  ;;  %v790_v8 = vpack.c.bf16 %v307_v7, %v306_v6  ;;  %v325_v10 = vld [vmem:[%s1240_s3 + $0x1f8] sm:$0xff]  ;;  %v308_v12 = vld [vmem:[%s1240_s3 + $0x170] sm:$0xff]  ;;  %v479_v35 = vld [vmem:[%s1242_s5 + $0x8] sm:$0xff] }
  0x20   :  { %174 = vmatpush1.msra.mxu1 %v57_v53  ;;  %225 = vmatprep.mubr.f32.mxu1 %v823_v3  ;;  %v792_v11 = vpack.c.bf16 %v325_v10, %v324_v9  ;;  %v481_v42 = vld [vmem:[%s1242_s5 + $0x18] sm:$0xff]  ;;  %v482_v48 = vld [vmem:[%s1242_s5 + $0x20] sm:$0xff]  ;;  %v488_v59 = vld [vmem:[%s1242_s5 + $0x50] sm:$0xff] }
  0x21   :  { %765 = vmatprep.subr.bf16.mxu1 %v764_v0  ;;  %v305_v0 = vld [vmem:[%s1240_s3 + $0x158] sm:$0xff]  ;;  %v486_v56 = vld [vmem:[%s1242_s5 + $0x40] sm:$0xff] }
  0x22   :  { %755 = vmatpush3.bf16.msra.mxu0 %v754_v38  ;;  %v786_v1 = vpack.c.bf16 %v305_v0, %v304_v63  ;;  %v485_v54 = vld [vmem:[%s1242_s5 + $0x38] sm:$0xff]  ;;  %v491_v63 = vld [vmem:[%s1242_s5 + $0x68] sm:$0xff] }
  0x23   :  { %580 = vmatmul.mubr.msk.f32.vlgmr.msra.gmra.mrb[8].mxu1 %vm59_vm0, %v27_v37  ;;  %v776_v37 = vpack.c.bf16 %v317_v34, %v316_v32  ;;  %757 = vmatprep.subr.bf16.mxu0 %v756_v45  ;;  %v478_v34 = vld [vmem:[%s1242_s5] sm:$0xff]  ;;  %v489_v60 = vld [vmem:[%s1242_s5 + $0x58] sm:$0xff] }
  0x24   :  { %231 = vmatprep.mubr.f32.mxu1 %v823_v3  ;;  %767 = vmatpush3.bf16.msra.mxu1 %v766_v5  ;;  %v788_v5 = vpack.c.bf16 %v323_v4, %v322_v2  ;;  %v797_v39 = vpack.c.bf16 %v479_v35, %v478_v34  ;;  %v493_v2 = vld [vmem:[%s1242_s5 + $0x78] sm:$0xff] }
  0x25   :  { %769 = vmatprep.subr.bf16.mxu1 %v768_v13  ;;  %v309_v13 = vld [vmem:[%s1240_s3 + $0x178] sm:$0xff] }
  0x26   :  { %759 = vmatpush3.bf16.msra.mxu0 %v758_v50  ;;  %v794_v14 = vpack.c.bf16 %v309_v13, %v308_v12  ;;  %v475_v13 = vstv %s1244_s0 }
  0x27   :  { %581 = vmatmul.mubr.msk.f32.gmra.mrb[10].mxu1 %vm59_vm0, %v28_v44  ;;  %v318_v44 = vld [vmem:[%s1240_s3 + $0x1c0] sm:$0xff]  ;;  %761 = vmatprep.subr.bf16.mxu0 %v760_v57  ;;  %v487_v57 = vld [vmem:[%s1242_s5 + $0x48] sm:$0xff] }
  0x28   :  { %237 = vmatprep.mubr.f32.mxu1 %v823_v3  ;;  %771 = vmatpush3.bf16.msra.mxu1 %v770_v17  ;;  %v809_v58 = vpack.c.bf16 %v487_v57, %v486_v56 }
  0x29   :  { %773 = vmatprep.subr.bf16.mxu1 %v772_v25 }
  0x2a   :  { %763 = vmatpush3.bf16.msra.mxu0 %v762_v62  ;;  %v490_v62 = vld [vmem:[%s1242_s5 + $0x60] sm:$0xff] }
  0x2b   :  { %582 = vmatmul.mubr.msk.f32.gmra.mrb[12].mxu1 %vm59_vm0, %v29_v49  ;;  %v780_v49 = vpack.c.bf16 %v319_v46, %v318_v44  ;;  %796 = vmatprep.subr.bf16.mxu0 %v824_v15  ;;  %v815_v0 = vpack.c.bf16 %v491_v63, %v490_v62 }
  0x2c   :  { %243 = vmatprep.mubr.f32.mxu1 %v823_v3  ;;  %775 = vmatpush3.bf16.msra.mxu1 %v774_v29 }
  0x2d   :  { %777 = vmatprep.subr.bf16.mxu1 %v776_v37 }
  0x2f   :  { %583 = vmatmul.mubr.msk.f32.gmra.mrb[14].mxu1 %vm59_vm0, %v30_v52  ;;  %v303_v52 = vld [vmem:[%s1240_s3 + $0x148] sm:$0xff] }
  0x30   :  { %779 = vmatpush3.bf16.msra.mxu1 %v778_v41  ;;  %v782_v53 = vpack.c.bf16 %v303_v52, %v302_v51  ;;  %v480_v41 = vld [vmem:[%s1242_s5 + $0x10] sm:$0xff] }
  0x31   :  { %781 = vmatprep.subr.bf16.mxu1 %v780_v49  ;;  %v800_v46 = vpack.c.bf16 %v481_v42, %v480_v41  ;;  %v483_v49 = vld [vmem:[%s1242_s5 + $0x28] sm:$0xff] }
  0x32   :  { %v803_v52 = vpack.c.bf16 %v483_v49, %v482_v48 }
  0x34   :  { %783 = vmatpush3.bf16.msra.mxu1 %v782_v53  ;;  %v484_v53 = vld [vmem:[%s1242_s5 + $0x30] sm:$0xff] }
  0x35   :  { %785 = vmatprep.subr.bf16.mxu1 %v784_v61  ;;  %v806_v55 = vpack.c.bf16 %v485_v54, %v484_v53  ;;  %v812_v61 = vpack.c.bf16 %v489_v60, %v488_v59 }
  0x38   :  { %787 = vmatpush3.bf16.msra.mxu1 %v786_v1  ;;  %v492_v1 = vld [vmem:[%s1242_s5 + $0x70] sm:$0xff] }
  0x39   :  { %789 = vmatprep.subr.bf16.mxu1 %v788_v5  ;;  %v818_v4 = vpack.c.bf16 %v493_v2, %v492_v1 }
  0x3c   :  { %791 = vmatpush3.bf16.msra.mxu1 %v790_v8  ;;  %v584_v8 = vld [vmem:[%s1243_s4] ss:$0 sm:$0xff] }
  0x3d   :  { %793 = vmatprep.subr.bf16.mxu1 %v792_v11 }
  0x40   :  { %795 = vmatpush3.bf16.msra.mxu1 %v794_v14 }
  0xe6   :  { %v138_v16 = vpop.f32.mrb[0].mxu1 }
  0xe7   :  { %v140_v17 = vpop.f32.mrb[1].mxu1 }
  0xe8   :  { %v250_v18 = vmax.f32 %v138_v16, %v140_v17 }
  0xea   :  { %v144_v19 = vpop.f32.mrb[2].mxu1 }
  0xeb   :  { %v146_v20 = vpop.f32.mrb[3].mxu1 }
  0xec   :  { %v251_v21 = vmax.f32 %v144_v19, %v146_v20 }
  0xee   :  { %v150_v22 = vpop.f32.mrb[4].mxu1 }
  0xef   :  { %v152_v23 = vpop.f32.mrb[5].mxu1 }
  0xf0   :  { %v252_v24 = vmax.f32 %v150_v22, %v152_v23 }
  0xf2   :  { %v156_v25 = vpop.f32.mrb[6].mxu1 }
  0xf3   :  { %v158_v26 = vpop.f32.mrb[7].mxu1 }
  0xf4   :  { %v253_v27 = vmax.f32 %v156_v25, %v158_v26 }
  0xf6   :  { %v227_v28 = vpop.f32.mrb[8].mxu1 }
  0xf7   :  { %v229_v29 = vpop.f32.mrb[9].mxu1 }
  0xf8   :  { %v254_v30 = vmax.f32 %v227_v28, %v229_v29 }
  0xfa   :  { %v258_v31 = vmax.f32 %v250_v18, %v254_v30  ;;  %v233_v32 = vpop.f32.mrb[10].mxu1 }
  0xfb   :  { %v235_v33 = vpop.f32.mrb[11].mxu1 }
  0xfc   :  { %v255_v36 = vmax.f32 %v233_v32, %v235_v33 }
  0xfe   :  { %v239_v37 = vpop.f32.mrb[12].mxu1  ;;  %v259_v38 = vmax.f32 %v251_v21, %v255_v36 }
  0xff   :  { %v241_v40 = vpop.f32.mrb[13].mxu1 }
 0x100   :  { %v256_v43 = vmax.f32 %v239_v37, %v241_v40  ;;  %397 = vmatprep.mubr.f32.mxu0 %v259_v38 }
 0x101   :  { %398 = vmatmul.mubr.f32.vlgmr.msra.gmra.mrb[0].mxu0 %v258_v31 }
 0x102   :  { %v260_v44 = vmax.f32 %v252_v24, %v256_v43  ;;  %v245_v45 = vpop.f32.mrb[14].mxu1  ;;  %798 = vmatpush3.bf16.msra.mxu0 %v797_v39  ;;  %705 = vmatprep.mubr.msk.f32.mxu0 %vm825_vm1, %v823_v3  ;;  %v585_v3 = vld [vmem:[%s1245_s6] ss:$0 sm:$0xff] }
 0x103   :  { %v247_v47 = vpop.f32.mrb[15].mxu1  ;;  %799 = vmatprep.subr.bf16.mxu0 %v824_v15 }
 0x104   :  { %v257_v50 = vmax.f32 %v245_v45, %v247_v47 }
 0x106   :  { %v261_v51 = vmax.f32 %v253_v27, %v257_v50  ;;  %801 = vmatpush3.bf16.msra.mxu0 %v800_v46 }
 0x107   :  { %802 = vmatprep.subr.bf16.mxu0 %v824_v15 }
 0x108   :  { %467 = vmatprep.mubr.f32.mxu1 %v261_v51 }
 0x109   :  { %468 = vmatmul.mubr.f32.vlgmr.msra.gmra.mrb[16].mxu1 %v260_v44 }
 0x10a   :  { %804 = vmatpush3.bf16.msra.mxu0 %v803_v52 }
 0x10b   :  { %805 = vmatprep.subr.bf16.mxu0 %v824_v15 }
 0x10e   :  { %807 = vmatpush3.bf16.msra.mxu0 %v806_v55 }
 0x10f   :  { %808 = vmatprep.subr.bf16.mxu0 %v824_v15 }
 0x112   :  { %810 = vmatpush3.bf16.msra.mxu0 %v809_v58 }
 0x113   :  { %811 = vmatprep.subr.bf16.mxu0 %v824_v15 }
 0x116   :  { %813 = vmatpush3.bf16.msra.mxu0 %v812_v61 }
 0x117   :  { %814 = vmatprep.subr.bf16.mxu0 %v824_v15 }
 0x11a   :  { %816 = vmatpush3.bf16.msra.mxu0 %v815_v0 }
 0x11b   :  { %817 = vmatprep.subr.bf16.mxu0 %v824_v15 }
 0x11e   :  { %819 = vmatpush3.bf16.msra.mxu0 %v818_v4 }
 0x1d4   :  { %v618_v5 = vpop.f32.mrb[0].mxu0 }
 0x1d5   :  { %v619_v6 = vpop.f32.mrb[1].mxu0 }
 0x1d6   :  { %v620_v7 = vadd.f32 %v619_v6, %v618_v5 }
 0x1d8   :  { %v400_v11 = vadd.f32 %v620_v7, %v584_v8 }
 0x1dc   :  { %v653_v9 = vpop.f32.mrb[16].mxu1 }
 0x1dd   :  { %v654_v10 = vpop.f32.mrb[17].mxu1 }
 0x1de   :  { %v655_v12 = vadd.f32 %v654_v10, %v653_v9 }
 0x1e0   :  { %v470_v14 = vadd.f32 %v655_v12, %v400_v11 }
 0x1e2   :  { %v476_v15 = vmul.f32 %v475_v13, %v470_v14  ;;  %vm474_vm2 = vcmp.gt.f32.partialorder %v470_v14, 0.0 }
 0x1e4   :  { %v477_v16 = vsel %vm474_vm2, %v470_v14, %v476_v15 }
 0x1e5   :  { %706 = vmatmul.mubr.f32.vlgmr.msra.gmra.mrb[2].mxu0 %v477_v16 }
 0x2b8   :  { %v567_v17 = vpop.f32.mrb[2].mxu0 }
 0x2b9   :  { %v568_v18 = vadd.f32 %v585_v3, %v567_v17  ;;  %v707_v19 = vpop.f32.mrb[3].mxu0 }
 0x2bb   :  { %571 = vst [vmem:[%s1246_s7] sm:$0xff] %v568_v18 }

</bundles_post_ra>
